<compile_context>
chip_gen: v7x
topology: tpu7x:2x2x1
jax: 0.10.0
libtpu: 0.0.40
codegen_flags: <defaults>
</compile_context>

<pallas_src>
import functools

import jax
import jax.numpy as jnp
from jax.experimental import pallas as pl
from jax.experimental.pallas import tpu as pltpu


def _pick_row_tile(n):
    """Largest nice row tile that divides N (sublane-aligned when possible)."""
    for t in (256, 128, 64, 32, 16, 8):
        if n % t == 0:
            return t
    return n


# ---------------------------------------------------------------------------
# Stage 1: fused projection kernel.
# ---------------------------------------------------------------------------
def gat_proj_kernel(h_ref, w_src_ref, w_dst_ref, bias_ref,
                    zsrc_ref, el_ref, res_ref, er_ref, *, hd):
    h = h_ref[...].astype(jnp.bfloat16)                                   # (T, Din)
    ps = jnp.dot(h, w_src_ref[...], preferred_element_type=jnp.float32)   # (T, HD+H)
    pd = jnp.dot(h, w_dst_ref[...], preferred_element_type=jnp.float32)   # (T, HD+H)
    zsrc_ref[...] = ps[:, :hd].astype(zsrc_ref.dtype)                     # (T, HD) bf16
    el_ref[...] = ps[:, hd:]                                              # (T, H)  f32
    res_ref[...] = pd[:, :hd] + bias_ref[...]                             # (T, HD) f32 (bias folded)
    er_ref[...] = pd[:, hd:]                                              # (T, H)  f32


# ---------------------------------------------------------------------------
# Stage 2: masked-softmax attention + neighborhood aggregation kernel.
# ---------------------------------------------------------------------------
def gat_attn_kernel(zsrc_ref, el_ref, res_ref, er_ref, adj_ref, out_ref, *,
                    num_heads, out_feats, negative_slope, apply_elu):
    z_src = zsrc_ref[...]                                    # (N, HD) bf16  all src rows
    el_t = jnp.transpose(el_ref[...])                        # (H, N)  f32   one XLU relayout
    er = er_ref[...]                                         # (T, H)  f32   dst row tile

    # Edge mask hoisted out of the head loop; reused by every head.
    mask = adj_ref[...] > 0                                  # (T, N) bool

    head_outs = []
    for hh in range(num_heads):                              # H is small & static
        e = er[:, hh:hh + 1] + el_t[hh:hh + 1, :]            # (T, N)
        e = jnp.where(e > 0, e, negative_slope * e)          # LeakyReLU (f32 VPU)
        e = jnp.where(mask, e, jnp.float32(-1e30))           # mask non-edges

        # Masked softmax over src nodes; exp(-1e30 - m) underflows to exactly 0,
        # and the self-loop/diagonal term guarantees denom >= 1 (no NaN possible).
        m = jnp.max(e, axis=-1, keepdims=True)               # (T, 1)
        p = jnp.exp(e - m)                                   # (T, N)
        denom = jnp.sum(p, axis=-1, keepdims=True)           # (T, 1)
        a = p * pl.reciprocal(denom, approx=True)            # divide -> EUP slot

        zh = z_src[:, hh * out_feats:(hh + 1) * out_feats]   # (N, Dout) bf16
        rst = jnp.dot(a.astype(jnp.bfloat16), zh,
                      preferred_element_type=jnp.float32)    # (T, Dout) bf16 MXU
        head_outs.append(rst)

    # Single lane-dense output store (no per-head partial vst.msk stores).
    out = jnp.concatenate(head_outs, axis=-1) + res_ref[...]
    if apply_elu:
        out = jnp.where(out > 0, out, jnp.exp(out) - 1.0)    # ELU(alpha=1)
    out_ref[...] = out.astype(out_ref.dtype)


def gat_conv(h, adj_bf16, w, attn_l, attn_r, w_res, bias, *,
             num_heads, out_feats, negative_slope, apply_elu):
    n, din = h.shape
    hd = num_heads * out_feats

    # Fold the per-head attention scoring into the projection weights:
    #   el = (h @ W)_h . attn_l_h == h @ (W_h @ attn_l_h)   (same for er / attn_r)
    w_heads = w.reshape(din, num_heads, out_feats)
    w_al = jnp.einsum('dhk,hk->dh', w_heads, attn_l)                      # (Din, H)
    w_ar = jnp.einsum('dhk,hk->dh', w_heads, attn_r)                      # (Din, H)
    w_src = jnp.concatenate([w, w_al], axis=-1).astype(jnp.bfloat16)      # (Din, HD+H)
    w_dst = jnp.concatenate([w_res, w_ar], axis=-1).astype(jnp.bfloat16)  # (Din, HD+H)

    t_row = _pick_row_tile(n)
    grid = (n // t_row,)

    # ---- Stage 1: projections (computed ONCE per layer, not per dst tile) ----
    z_src, el, res_b, er = pl.pallas_call(
        functools.partial(gat_proj_kernel, hd=hd),
        out_shape=(jax.ShapeDtypeStruct((n, hd), jnp.bfloat16),
                   jax.ShapeDtypeStruct((n, num_heads), jnp.float32),
                   jax.ShapeDtypeStruct((n, hd), jnp.float32),
                   jax.ShapeDtypeStruct((n, num_heads), jnp.float32)),
        grid_spec=pltpu.PrefetchScalarGridSpec(
            num_scalar_prefetch=0,
            grid=grid,
            in_specs=[
                pl.BlockSpec((t_row, din), lambda i: (i, 0)),             # h row tile
                pl.BlockSpec((din, hd + num_heads), lambda i: (0, 0)),    # [W | W@A_l]
                pl.BlockSpec((din, hd + num_heads), lambda i: (0, 0)),    # [W_res | W@A_r]
                pl.BlockSpec((1, hd), lambda i: (0, 0)),                  # bias
            ],
            out_specs=(
                pl.BlockSpec((t_row, hd), lambda i: (i, 0)),
                pl.BlockSpec((t_row, num_heads), lambda i: (i, 0)),
                pl.BlockSpec((t_row, hd), lambda i: (i, 0)),
                pl.BlockSpec((t_row, num_heads), lambda i: (i, 0)),
            )),
        compiler_params=pltpu.CompilerParams(
            dimension_semantics=("parallel",)),
    )(h, w_src, w_dst, bias)

    # ---- Stage 2: attention + aggregation per dst-row tile ----
    out = pl.pallas_call(
        functools.partial(gat_attn_kernel, num_heads=num_heads, out_feats=out_feats,
                          negative_slope=negative_slope, apply_elu=apply_elu),
        out_shape=jax.ShapeDtypeStruct((n, hd), jnp.float32),
        grid_spec=pltpu.PrefetchScalarGridSpec(
            num_scalar_prefetch=0,
            grid=grid,
            in_specs=[
                pl.BlockSpec((n, hd), lambda i: (0, 0)),                  # z_src: all src rows (bf16)
                pl.BlockSpec((n, num_heads), lambda i: (0, 0)),           # el: all src rows
                pl.BlockSpec((t_row, hd), lambda i: (i, 0)),              # res + bias tile
                pl.BlockSpec((t_row, num_heads), lambda i: (i, 0)),       # er tile
                pl.BlockSpec((t_row, n), lambda i: (i, 0)),               # adj row tile (bf16)
            ],
            out_specs=pl.BlockSpec((t_row, hd), lambda i: (i, 0)),
        ),
        compiler_params=pltpu.CompilerParams(
            dimension_semantics=("parallel",)),
    )(z_src, el, res_b, er, adj_bf16)
    return out


def init_gat_params(key, num_layers, in_dim, num_hidden, num_classes, heads):
    """Deterministic xavier-ish init matching DGL GATConv parameter shapes."""
    def layer_params(key, din, dout, nheads):
        k1, k2, k3, k4 = jax.random.split(key, 4)
        scale_w = (2.0 / (din + nheads * dout)) ** 0.5
        scale_a = (2.0 / (1 + dout)) ** 0.5
        return dict(
            w=scale_w * jax.random.normal(k1, (din, nheads * dout), jnp.float32),
            attn_l=scale_a * jax.random.normal(k2, (nheads, dout), jnp.float32),
            attn_r=scale_a * jax.random.normal(k3, (nheads, dout), jnp.float32),
            w_res=scale_w * jax.random.normal(k4, (din, nheads * dout), jnp.float32),
            bias=jnp.zeros((1, nheads * dout), jnp.float32),
            num_heads=nheads, out_feats=dout)

    params = []
    keys = jax.random.split(key, num_layers + 1)
    if num_layers == 0:
        params.append(layer_params(keys[0], in_dim, num_classes, heads[0]))
        return params
    params.append(layer_params(keys[0], in_dim, num_hidden[0], heads[0]))
    for l in range(1, num_layers):
        params.append(layer_params(keys[l], num_hidden[l - 1] * heads[l - 1],
                                   num_hidden[l], heads[l]))
    params.append(layer_params(keys[num_layers], num_hidden[-1] * heads[-2],
                               num_classes, heads[-1]))
    return params


def gat_forward(x, adj, params, negative_slope):
    adj_bf16 = adj.astype(jnp.bfloat16)   # halve the O(N^2) mask DMA; cast once
    h = x
    # hidden GATConv layers: ELU activation, heads concatenated (== flatten(1))
    for p in params[:-1]:
        h = gat_conv(h, adj_bf16, p["w"], p["attn_l"], p["attn_r"], p["w_res"],
                     p["bias"], num_heads=p["num_heads"], out_feats=p["out_feats"],
                     negative_slope=negative_slope, apply_elu=True)
    # output GATConv layer: no activation, mean over heads
    p = params[-1]
    out = gat_conv(h, adj_bf16, p["w"], p["attn_l"], p["attn_r"], p["w_res"],
                   p["bias"], num_heads=p["num_heads"], out_feats=p["out_feats"],
                   negative_slope=negative_slope, apply_elu=False)
    n = out.shape[0]
    logits = out.reshape(n, p["num_heads"], p["out_feats"]).mean(axis=1)
    return logits


if __name__ == "__main__":
    # Small GAT config: 1 hidden layer + output layer.
    num_layers = 1
    N = 64            # number of graph nodes
    in_dim = 16
    num_hidden = [32]
    num_classes = 8
    heads = [2, 2]
    negative_slope = 0.2

    key = jax.random.PRNGKey(0)
    kx, kp = jax.random.split(key)

    # Node features.
    x = jax.random.normal(kx, (N, in_dim), jnp.float32)

    # Deterministic graph: ring (both directions) plus self-loops, as a dense
    # adjacency mask adj[dst, src].
    eye = jnp.eye(N, dtype=jnp.float32)
    adj = jnp.clip(eye + jnp.roll(eye, 1, axis=1) + jnp.roll(eye, -1, axis=1),
                   0.0, 1.0)

    params = init_gat_params(kp, num_layers, in_dim, num_hidden, num_classes, heads)

    logits = gat_forward(x, adj, params, negative_slope)
    jax.block_until_ready(logits)
    assert logits.shape == (N, num_classes)
    print("KERNEL_OK")
</pallas_src>

<mosaic_0001>
module attributes {stable_mosaic.version = 11 : i64} {
  func.func @gat_proj_kernel(%arg0: i32, %arg1: memref<64x16xf32, #tpu.memory_space<vmem>>, %arg2: memref<16x66xbf16, #tpu.memory_space<vmem>>, %arg3: memref<16x66xbf16, #tpu.memory_space<vmem>>, %arg4: memref<1x64xf32, #tpu.memory_space<vmem>>, %arg5: memref<64x64xbf16, #tpu.memory_space<vmem>>, %arg6: memref<64x2xf32, #tpu.memory_space<vmem>>, %arg7: memref<64x64xf32, #tpu.memory_space<vmem>>, %arg8: memref<64x2xf32, #tpu.memory_space<vmem>>) attributes {dimension_semantics = [#tpu.dimension_semantics<parallel>], iteration_bounds = array<i64: 1>, scalar_prefetch = 0 : i64, scratch_operands = 0 : i64, tpu.core_type = #tpu.core_type<tc>, window_params = [{transform_indices = @transform_0, window_bounds = array<i64: 64, 16>}, {pipeline_mode = #tpu.pipeline_mode<synchronous>, transform_indices = @transform_1, window_bounds = array<i64: 16, 66>}, {pipeline_mode = #tpu.pipeline_mode<synchronous>, transform_indices = @transform_2, window_bounds = array<i64: 16, 66>}, {pipeline_mode = #tpu.pipeline_mode<synchronous>, transform_indices = @transform_3, window_bounds = array<i64: 1, 64>}, {transform_indices = @transform_4, window_bounds = array<i64: 64, 64>}, {transform_indices = @transform_5, window_bounds = array<i64: 64, 2>}, {transform_indices = @transform_6, window_bounds = array<i64: 64, 64>}, {transform_indices = @transform_7, window_bounds = array<i64: 64, 2>}]} {
    %c0 = arith.constant 0 : index
    %c0_0 = arith.constant 0 : index
    %0 = vector.load %arg1[%c0, %c0_0] : memref<64x16xf32, #tpu.memory_space<vmem>>, vector<64x16xf32>
    %1 = arith.truncf %0 : vector<64x16xf32> to vector<64x16xbf16>
    %c0_1 = arith.constant 0 : index
    %c0_2 = arith.constant 0 : index
    %2 = vector.load %arg2[%c0_1, %c0_2] : memref<16x66xbf16, #tpu.memory_space<vmem>>, vector<16x66xbf16>
    %cst = arith.constant dense<0.000000e+00> : vector<64x66xf32>
    %3 = tpu.matmul %1, %2, %cst {dimension_numbers = #tpu.dot_dimension_numbers<[1], [0], [0], [1], [0, 0, 1, 1], [], []>} : vector<64x16xbf16>, vector<16x66xbf16>, vector<64x66xf32> -> vector<64x66xf32>
    %c0_3 = arith.constant 0 : index
    %c0_4 = arith.constant 0 : index
    %4 = vector.load %arg3[%c0_3, %c0_4] : memref<16x66xbf16, #tpu.memory_space<vmem>>, vector<16x66xbf16>
    %cst_5 = arith.constant dense<0.000000e+00> : vector<64x66xf32>
    %5 = tpu.matmul %1, %4, %cst_5 {dimension_numbers = #tpu.dot_dimension_numbers<[1], [0], [0], [1], [0, 0, 1, 1], [], []>} : vector<64x16xbf16>, vector<16x66xbf16>, vector<64x66xf32> -> vector<64x66xf32>
    %6 = vector.extract_strided_slice %3 {offsets = [0, 0], sizes = [64, 64], strides = [1, 1]} : vector<64x66xf32> to vector<64x64xf32>
    %7 = arith.truncf %6 : vector<64x64xf32> to vector<64x64xbf16>
    %c0_6 = arith.constant 0 : index
    %c0_7 = arith.constant 0 : index
    %8 = vector.load %arg5[%c0_6, %c0_7] : memref<64x64xbf16, #tpu.memory_space<vmem>>, vector<64x64xbf16>
    tpu.vector_store %arg5[%c0_6, %c0_7], %7 {strides = array<i32>} : memref<64x64xbf16, #tpu.memory_space<vmem>>, vector<64x64xbf16>,
    %9 = vector.extract_strided_slice %3 {offsets = [0, 64], sizes = [64, 2], strides = [1, 1]} : vector<64x66xf32> to vector<64x2xf32>
    %c0_8 = arith.constant 0 : index
    %c0_9 = arith.constant 0 : index
    %10 = vector.load %arg6[%c0_8, %c0_9] : memref<64x2xf32, #tpu.memory_space<vmem>>, vector<64x2xf32>
    tpu.vector_store %arg6[%c0_8, %c0_9], %9 {strides = array<i32>} : memref<64x2xf32, #tpu.memory_space<vmem>>, vector<64x2xf32>,
    %11 = vector.extract_strided_slice %5 {offsets = [0, 0], sizes = [64, 64], strides = [1, 1]} : vector<64x66xf32> to vector<64x64xf32>
    %c0_10 = arith.constant 0 : index
    %c0_11 = arith.constant 0 : index
    %12 = vector.load %arg4[%c0_10, %c0_11] : memref<1x64xf32, #tpu.memory_space<vmem>>, vector<1x64xf32>
    %13 = vector.broadcast %12 : vector<1x64xf32> to vector<64x64xf32>
    %14 = arith.addf %11, %13 : vector<64x64xf32>
    %c0_12 = arith.constant 0 : index
    %c0_13 = arith.constant 0 : index
    %15 = vector.load %arg7[%c0_12, %c0_13] : memref<64x64xf32, #tpu.memory_space<vmem>>, vector<64x64xf32>
    tpu.vector_store %arg7[%c0_12, %c0_13], %14 {strides = array<i32>} : memref<64x64xf32, #tpu.memory_space<vmem>>, vector<64x64xf32>,
    %16 = vector.extract_strided_slice %5 {offsets = [0, 64], sizes = [64, 2], strides = [1, 1]} : vector<64x66xf32> to vector<64x2xf32>
    %c0_14 = arith.constant 0 : index
    %c0_15 = arith.constant 0 : index
    %17 = vector.load %arg8[%c0_14, %c0_15] : memref<64x2xf32, #tpu.memory_space<vmem>>, vector<64x2xf32>
    tpu.vector_store %arg8[%c0_14, %c0_15], %16 {strides = array<i32>} : memref<64x2xf32, #tpu.memory_space<vmem>>, vector<64x2xf32>,
    return
  }
  func.func @transform_0(%arg0: i32) -> (i32, i32) {
    %c0_i32 = arith.constant 0 : i32
    %c0_i32_0 = arith.constant 0 : i32
    return %arg0, %c0_i32 : i32, i32
  }
  func.func @transform_1(%arg0: i32) -> (i32, i32) {
    %c0_i32 = arith.constant 0 : i32
    %c0_i32_0 = arith.constant 0 : i32
    %c0_i32_1 = arith.constant 0 : i32
    return %c0_i32, %c0_i32_0 : i32, i32
  }
  func.func @transform_2(%arg0: i32) -> (i32, i32) {
    %c0_i32 = arith.constant 0 : i32
    %c0_i32_0 = arith.constant 0 : i32
    %c0_i32_1 = arith.constant 0 : i32
    return %c0_i32, %c0_i32_0 : i32, i32
  }
  func.func @transform_3(%arg0: i32) -> (i32, i32) {
    %c0_i32 = arith.constant 0 : i32
    %c0_i32_0 = arith.constant 0 : i32
    %c0_i32_1 = arith.constant 0 : i32
    return %c0_i32, %c0_i32_0 : i32, i32
  }
  func.func @transform_4(%arg0: i32) -> (i32, i32) {
    %c0_i32 = arith.constant 0 : i32
    %c0_i32_0 = arith.constant 0 : i32
    return %arg0, %c0_i32 : i32, i32
  }
  func.func @transform_5(%arg0: i32) -> (i32, i32) {
    %c0_i32 = arith.constant 0 : i32
    %c0_i32_0 = arith.constant 0 : i32
    return %arg0, %c0_i32 : i32, i32
  }
  func.func @transform_6(%arg0: i32) -> (i32, i32) {
    %c0_i32 = arith.constant 0 : i32
    %c0_i32_0 = arith.constant 0 : i32
    return %arg0, %c0_i32 : i32, i32
  }
  func.func @transform_7(%arg0: i32) -> (i32, i32) {
    %c0_i32 = arith.constant 0 : i32
    %c0_i32_0 = arith.constant 0 : i32
    return %arg0, %c0_i32 : i32, i32
  }
}

</mosaic_0001>

<bundles_post_ra>
// kernel: tpu_custom_call.1
= control target key start
LH: loop header
LB: loop body
LE: loop exit
PB: predicated region body
PF: predicated region fallthrough
CT: control target
= control target key end

     0   :  { %13 = vsyncpa [#allocation3], 0  ;;  %vm44_vm0 = vcmask 130048   ;;  %s714_s0 = inlined_call_operand.vmem [shape: f32[64,16], index: 0, kind: input, shape index: {}]   ;;  %s715_s1 = inlined_call_operand.vmem [shape: bf16[16,66], index: 1, kind: input, shape index: {}]   ;;  %s716_s2 = inlined_call_operand.vmem [shape: bf16[16,66], index: 2, kind: input, shape index: {}]   ;;  %s717_s3 = inlined_call_operand.vmem [shape: f32[1,64], index: 3, kind: input, shape index: {}]   ;;  %s718_s4 = inlined_call_operand.hbm [shape: bf16[64,64], index: 4, kind: output, shape index: {0}]   ;;  %s719_s5 = inlined_call_operand.vmem [shape: f32[64,2], index: 5, kind: output, shape index: {1}]   ;;  %s720_s6 = inlined_call_operand.hbm [shape: f32[64,64], index: 6, kind: output, shape index: {2}]   ;;  %s721_s7 = inlined_call_operand.vmem [shape: f32[64,2], index: 7, kind: output, shape index: {3}]  }
   0x1   :  { %v444_v0 = vld [vmem:[%s715_s1] sm:$0xff]   ;;  %v25_v3 = vld [vmem:[%s714_s0 + $0x8] sm:$0xff]  ;;  %v26_v4 = vld [vmem:[%s714_s0 + $0x10] sm:$0xff] }
   0x2   :  { %v445_v1 = vld [vmem:[%s716_s2] sm:$0xff]   ;;  %418 = vmatprep.subr.bf16.mxu0 %v444_v0  ;;  %v27_v6 = vld [vmem:[%s714_s0 + $0x18] sm:$0xff]  ;;  %v29_v8 = vld [vmem:[%s714_s0 + $0x28] sm:$0xff] }
   0x3   :  { %v24_v2 = vld [vmem:[%s714_s0] sm:$0xff]  ;;  %428 = vmatprep.subr.bf16.mxu1 %v445_v1  ;;  %419 = vmatpush3.bf16.msra.mxu0 %v444_v0  ;;  %v33_v9 = vpack.c.bf16 %v27_v6, %v26_v4 }
   0x4   :  { %v32_v5 = vpack.c.bf16 %v25_v3, %v24_v2  ;;  %v28_v7 = vld [vmem:[%s714_s0 + $0x20] sm:$0xff]  ;;  %429 = vmatpush3.bf16.msra.mxu1 %v445_v1 }
   0x5   :  { %v34_v10 = vpack.c.bf16 %v29_v8, %v28_v7 }
   0x6   :  { %14 = vsyncpa [#allocation5], 0  ;;  %420 = vmatprep.mubr.msk.bf16.mxu0 %vm44_vm0, %v32_v5  ;;  %430 = vmatprep.mubr.msk.bf16.mxu1 %vm44_vm0, %v32_v5  ;;  %v30_v11 = vld [vmem:[%s714_s0 + $0x30] sm:$0xff]  ;;  %v31_v12 = vld [vmem:[%s714_s0 + $0x38] sm:$0xff]  ;;  %vm227_vm1 = vcmask 519168   ;;  %vm292_vm2 = vcmask 523264  }
   0x7   :  { %421 = vmatmul.mubr.msk.bf16.vlgmr.msra.gmra.mrb[0].mxu0 %vm44_vm0, %v33_v9  ;;  %431 = vmatmul.mubr.msk.bf16.vlgmr.msra.gmra.mrb[0].mxu1 %vm44_vm0, %v33_v9  ;;  %v35_v13 = vpack.c.bf16 %v31_v12, %v30_v11  ;;  %v399_v14 = vld [vmem:[%s717_s3] ss:$0 sm:$0xff]  ;;  %s494_s21 = smov 64   ;;  %s495_s0 = smov [#allocation2]  }
   0x8   :  { %424 = vmatprep.mubr.msk.bf16.mxu0 %vm44_vm0, %v34_v10  ;;  %434 = vmatprep.mubr.msk.bf16.mxu1 %vm44_vm0, %v34_v10  ;;  %s346_s3 = sshll.u32 %s495_s0, 4  ;;  %s496_s22 = smov [#allocation4]   ;;  %s347_s3 = int_to_ptr.vmem [resolvable:$true] %s346_s3 }
   0x9   :  { %s360_s23 = sshll.u32 %s496_s22, 4  ;;  %s446_s24 = scalar_lea.vmem %s347_s3, 512  ;;  %s609_s23 = int_to_ptr.vmem [resolvable:$true] %s360_s23 }
   0xa   :  { %p447_p0 = scmp.ne.s32.totalorder %s347_s3, %s446_s24  ;;  %p451_p1 = scmp.lt.s32.totalorder %s347_s3, %s347_s3 }
   0xb   :  { %p452_p2 = scmp.lt.s32.totalorder %s446_s24, %s446_s24 }
   0xd   :  { %p453_p3 = por %p452_p2, %p451_p1 }
   0xf   :  { %425 = vmatmul.mubr.msk.bf16.gmra.mrb[4].mxu0 %vm44_vm0, %v35_v13  ;;  %435 = vmatmul.mubr.msk.bf16.gmra.mrb[4].mxu1 %vm44_vm0, %v35_v13  ;;  %p454_p4 = pnand %p453_p3, %p447_p0 }
  0xda   :  { %v422_v15 = vpop.f32.mrb[0].mxu0  ;;  %v432_v17 = vpop.f32.mrb[0].mxu1 }
  0xdb   :  { %v402_v16 = vpack.c.bf16 %v422_v15, %v422_v15  ;;  %248 = vrot.lane.b32.xlu1 %v422_v15, %s494_s21  ;;  %v91_v18 = vpop.f32.mrb[1].mxu0  ;;  %v286_v19 = vadd.f32 %v432_v17, %v399_v14  ;;  %313 = vrot.lane.b32.xlu0 %v432_v17, %s494_s21  ;;  %v164_v20 = vpop.f32.mrb[1].mxu1 }
  0xdc   :  { %v400_v21 = vpack.c.bf16 %v91_v18, %v91_v18  ;;  %v423_v22 = vpop.f32.mrb[2].mxu0  ;;  %v284_v23 = vadd.f32 %v399_v14, %v164_v20  ;;  %v433_v25 = vpop.f32.mrb[2].mxu1 }
  0xdd   :  { %230 = vst.msk [vmem:[#allocation2 + $0x8] sm:$0xf] %vm227_vm1, %v402_v16  ;;  %v403_v24 = vpack.c.bf16 %v423_v22, %v423_v22  ;;  %v94_v26 = vpop.f32.mrb[3].mxu0  ;;  %v287_v27 = vadd.f32 %v433_v25, %v399_v14  ;;  %v167_v29 = vpop.f32.mrb[3].mxu1 }
  0xde   :  { %295 = vst.msk [vmem:[#allocation4 + $0x10] sm:$0xff] %vm292_vm2, %v286_v19  ;;  %v401_v28 = vpack.c.bf16 %v94_v26, %v94_v26  ;;  %293 = vst.msk [vmem:[#allocation4] sm:$0xff] %vm292_vm2, %v284_v23  ;;  %v285_v30 = vadd.f32 %v399_v14, %v167_v29 }
  0xdf   :  { %228 = vst.msk [vmem:[#allocation2] sm:$0xf] %vm227_vm1, %v400_v21  ;;  %231 = vst.msk [vmem:[#allocation2 + $0xc] sm:$0xf] %vm227_vm1, %v403_v24  ;;  %250 = vrot.lane.b32.xlu1 %v423_v22, %s494_s21  ;;  %244 = vrot.lane.b32.xlu0 %v91_v18, %s494_s21 }
  0xe0   :  { %296 = vst.msk [vmem:[#allocation4 + $0x18] sm:$0xff] %vm292_vm2, %v287_v27  ;;  %294 = vst.msk [vmem:[#allocation4 + $0x8] sm:$0xff] %vm292_vm2, %v285_v30 }
  0xe1   :  { %229 = vst.msk [vmem:[#allocation2 + $0x4] sm:$0xf] %vm227_vm1, %v401_v28 }
  0xe2   :  { %v426_v31 = vpop.f32.mrb[4].mxu0  ;;  %v594_v34 = vpop.f32.mrb[4].mxu1 }
  0xe3   :  { %315 = vrot.lane.b32.xlu1 %v433_v25, %s494_s21  ;;  %v406_v32 = vpack.c.bf16 %v426_v31, %v426_v31  ;;  %v107_v33 = vpop.f32.mrb[5].mxu0  ;;  %309 = vrot.lane.b32.xlu0 %v164_v20, %s494_s21  ;;  %v290_v37 = vadd.f32 %v594_v34, %v399_v14  ;;  %v180_v38 = vpop.f32.mrb[5].mxu1 }
  0xe4   :  { %v404_v35 = vpack.c.bf16 %v107_v33, %v107_v33  ;;  %v427_v36 = vpop.f32.mrb[6].mxu0  ;;  %v288_v41 = vadd.f32 %v399_v14, %v180_v38  ;;  %v437_v42 = vpop.f32.mrb[6].mxu1 }
  0xe5   :  { %234 = vst.msk [vmem:[#allocation2 + $0x18] sm:$0xf] %vm227_vm1, %v406_v32  ;;  %v407_v39 = vpack.c.bf16 %v427_v36, %v427_v36  ;;  %v110_v40 = vpop.f32.mrb[7].mxu0  ;;  %v291_v44 = vadd.f32 %v437_v42, %v399_v14  ;;  %v183_v45 = vpop.f32.mrb[7].mxu1 }
  0xe6   :  { %232 = vst.msk [vmem:[#allocation2 + $0x10] sm:$0xf] %vm227_vm1, %v404_v35  ;;  %v405_v43 = vpack.c.bf16 %v110_v40, %v110_v40  ;;  %v289_v46 = vadd.f32 %v399_v14, %v183_v45 }
  0xe7   :  { %299 = vst.msk [vmem:[#allocation4 + $0x30] sm:$0xff] %vm292_vm2, %v290_v37  ;;  %311 = vrot.lane.b32.xlu1 %v167_v29, %s494_s21  ;;  %297 = vst.msk [vmem:[#allocation4 + $0x20] sm:$0xff] %vm292_vm2, %v288_v41  ;;  %246 = vrot.lane.b32.xlu0 %v94_v26, %s494_s21 }
  0xe8   :  { %235 = vst.msk [vmem:[#allocation2 + $0x1c] sm:$0xf] %vm227_vm1, %v407_v39  ;;  %233 = vst.msk [vmem:[#allocation2 + $0x14] sm:$0xf] %vm227_vm1, %v405_v43 }
  0xe9   :  { %300 = vst.msk [vmem:[#allocation4 + $0x38] sm:$0xff] %vm292_vm2, %v291_v44  ;;  %298 = vst.msk [vmem:[#allocation4 + $0x28] sm:$0xff] %vm292_vm2, %v289_v46 }
  0xeb   :  { %258 = vrot.lane.b32.xlu1 %v427_v36, %s494_s21  ;;  %256 = vrot.lane.b32.xlu0 %v426_v31, %s494_s21 }
  0xec   :  { %457 = shalt.err (!%p454_p4)
}
  0xed   :  { %s458_s27 = scalar_lea.hbm %s718_s4, 512 }
  0xee   :  { %p459_p5 = scmp.ne.s32.totalorder %s718_s4, %s458_s27  ;;  %p462_p6 = scmp.lt.u32.totalorder %s458_s27, %s718_s4 }
  0xf0   :  { %p464_p7 = pnand %p462_p6, %p459_p5 }
  0xf2   :  { %467 = shalt.err (!%p464_p7)
}
  0xf3   :  { %s497_s9 = smov 4   ;;  %s468_s11 = scalar_lea.vmem %s609_s23, 1024 }
  0xf4   :  { %352 = dma.vmem_to_hbm [thread:$0]  %s347_s3, 512, %s718_s4, [#allocation3], %s494_s21, %s494_s21, %s497_s9  }
  0xf5   :  { %p469_p8 = scmp.ne.s32.totalorder %s609_s23, %s468_s11  ;;  %p473_p9 = scmp.lt.s32.totalorder %s609_s23, %s609_s23 }
  0xf6   :  { %p474_p10 = scmp.lt.s32.totalorder %s468_s11, %s468_s11 }
  0xf8   :  { %p475_p11 = por %p474_p10, %p473_p9 }
  0xfa   :  { %p476_p12 = pnand %p475_p11, %p469_p8 }
  0xfc   :  { %479 = shalt.err (!%p476_p12)
}
  0xfd   :  { %s480_s13 = scalar_lea.hbm %s720_s6, 1024 }
  0xfe   :  { %p481_p13 = scmp.ne.s32.totalorder %s720_s6, %s480_s13  ;;  %p484_p0 = scmp.lt.u32.totalorder %s480_s13, %s720_s6 }
 0x100   :  { %p486_p1 = pnand %p484_p0, %p481_p13 }
 0x102   :  { %489 = shalt.err (!%p486_p1)
}
 0x103   :  { %s498_s4 = smov 128   ;;  %s499_s18 = smov 8   ;;  %254 = vrot.lane.b32.xlu1 %v110_v40, %s494_s21  ;;  %252 = vrot.lane.b32.xlu0 %v107_v33, %s494_s21  ;;  %vm268_vm3 = vcmask 15360  }
 0x104   :  { %366 = dma.vmem_to_hbm [thread:$0]  %s609_s23, 1024, %s720_s6, [#allocation5], %s498_s4, %s498_s4, %s499_s18  }
 0x107   :  { %319 = vrot.lane.b32.xlu1 %v183_v45, %s494_s21  ;;  %317 = vrot.lane.b32.xlu0 %v180_v38, %s494_s21 }
 0x10b   :  { %323 = vrot.lane.b32.xlu1 %v437_v42, %s494_s21  ;;  %321 = vrot.lane.b32.xlu0 %v594_v34, %s494_s21 }
 0x14d   :  { %v249_v47 = vpop.permute.xlu1 %248  ;;  %v314_v48 = vpop.permute.xlu0 %313 }
 0x14e   :  { %271 = vst.msk [vmem:[%s719_s5 + $0x10] sm:$0xff] %vm268_vm3, %v249_v47  ;;  %335 = vst.msk [vmem:[%s721_s7 + $0x10] sm:$0xff] %vm268_vm3, %v314_v48 }
 0x151   :  { %v251_v49 = vpop.permute.xlu1 %250  ;;  %v245_v50 = vpop.permute.xlu0 %244 }
 0x152   :  { %272 = vst.msk [vmem:[%s719_s5 + $0x18] sm:$0xff] %vm268_vm3, %v251_v49  ;;  %269 = vst.msk [vmem:[%s719_s5] sm:$0xff] %vm268_vm3, %v245_v50 }
 0x155   :  { %v316_v51 = vpop.permute.xlu1 %315  ;;  %v310_v52 = vpop.permute.xlu0 %309 }
 0x156   :  { %336 = vst.msk [vmem:[%s721_s7 + $0x18] sm:$0xff] %vm268_vm3, %v316_v51  ;;  %333 = vst.msk [vmem:[%s721_s7] sm:$0xff] %vm268_vm3, %v310_v52 }
 0x159   :  { %v312_v53 = vpop.permute.xlu1 %311  ;;  %v247_v54 = vpop.permute.xlu0 %246 }
 0x15a   :  { %334 = vst.msk [vmem:[%s721_s7 + $0x8] sm:$0xff] %vm268_vm3, %v312_v53  ;;  %270 = vst.msk [vmem:[%s719_s5 + $0x8] sm:$0xff] %vm268_vm3, %v247_v54 }
 0x15d   :  { %v259_v55 = vpop.permute.xlu1 %258  ;;  %v257_v56 = vpop.permute.xlu0 %256 }
 0x15e   :  { %276 = vst.msk [vmem:[%s719_s5 + $0x38] sm:$0xff] %vm268_vm3, %v259_v55  ;;  %275 = vst.msk [vmem:[%s719_s5 + $0x30] sm:$0xff] %vm268_vm3, %v257_v56 }
 0x175   :  { %v255_v57 = vpop.permute.xlu1 %254  ;;  %v253_v58 = vpop.permute.xlu0 %252 }
 0x176   :  { %274 = vst.msk [vmem:[%s719_s5 + $0x28] sm:$0xff] %vm268_vm3, %v255_v57  ;;  %273 = vst.msk [vmem:[%s719_s5 + $0x20] sm:$0xff] %vm268_vm3, %v253_v58 }
 0x179   :  { %v320_v59 = vpop.permute.xlu1 %319  ;;  %v318_v60 = vpop.permute.xlu0 %317 }
 0x17a   :  { %338 = vst.msk [vmem:[%s721_s7 + $0x28] sm:$0xff] %vm268_vm3, %v320_v59  ;;  %337 = vst.msk [vmem:[%s721_s7 + $0x20] sm:$0xff] %vm268_vm3, %v318_v60 }
 0x17d   :  { %v324_v61 = vpop.permute.xlu1 %323  ;;  %v322_v62 = vpop.permute.xlu0 %321 }
 0x17e   :  { %340 = vst.msk [vmem:[%s721_s7 + $0x38] sm:$0xff] %vm268_vm3, %v324_v61  ;;  %339 = vst.msk [vmem:[%s721_s7 + $0x30] sm:$0xff] %vm268_vm3, %v322_v62 }
 0x17f   :  { %490 = dma.done.wait [#allocation3], 512  }
 0x180   :  { %491 = vsyncadd [#allocation3], 4294966784 }
 0x181   :  { %492 = dma.done.wait [#allocation5], 1024  }
 0x182   :  { %493 = vsyncadd [#allocation5], 4294966272 }
 0x183   :  { %379 = vsyncpa [#allocation3], 1 }
 0x184   :  { %380 = vsyncpa [#allocation5], 1 }

</bundles_post_ra>
